<compile_context>
chip_gen: v5e
topology: v5e:2x2
jax: 0.10.0
libtpu: 0.0.40
codegen_flags: <defaults>
</compile_context>

<pallas_src>
import functools
import math

import jax
import jax.numpy as jnp
from jax.experimental import pallas as pl
from jax.experimental.pallas import tpu as pltpu


# ----------------------------------------------------------------------------
# Kernel
# ----------------------------------------------------------------------------
def make_rnn_fc_kernel(nlayers: int, T: int, Bp: int):
    """Kernel ref order:
      x_ref      (T*Bp, F)        f32   time-major, batch-padded input
      wih0_ref   (F, Hp)          f32   layer-0 input weights (transposed, padded)
      b0_ref     (1, Hp)          f32   layer-0 bias (b_ih + b_hh)
      whh0_ref   (Hp, Hp)         f32   layer-0 recurrent weights
      per layer l>=1: wcat_ref (2*Hp, Hp), b_ref (1, Hp)   fused [Wih; Whh]
      wfc_ref    (Hp, Opad) f32, bfc_ref (1, Opad) f32
      outputs:   out_ref (T*Bp, Opad) f32, hidden_ref (nlayers, Bp, Hp) f32
    """

    def kernel(*refs):
        x_ref, wih0_ref, b0_ref, whh0_ref = refs[0:4]
        n_mid = 2 * (nlayers - 1)
        mid_refs = refs[4:4 + n_mid]
        wfc_ref, bfc_ref, out_ref, hidden_ref = refs[4 + n_mid:8 + n_mid]

        Hp = whh0_ref.shape[1]

        # Hoisted layer-0 input projection: one (T*Bp, F) x (F, Hp) matmul
        # with the summed bias folded in.
        xp0 = (
            jnp.dot(x_ref[...], wih0_ref[...],
                    preferred_element_type=jnp.float32)
            + b0_ref[...]
        )                                           # (T*Bp, Hp) f32
        whh0 = whh0_ref[...]
        wcats = [mid_refs[2 * (l - 1)][...] for l in range(1, nlayers)]
        biases = [mid_refs[2 * (l - 1) + 1][...] for l in range(1, nlayers)]

        # Wavefront recurrence, fully unrolled over the small static T.
        # All per-step activations are full (Bp, Hp) = (8, 128) vregs.
        h = [jnp.zeros((Bp, Hp), jnp.float32) for _ in range(nlayers)]
        top_outs = []
        for t in range(T):
            # Layer 0: pre-projected input + recurrence (aligned static slice).
            h[0] = jnp.tanh(
                xp0[t * Bp:(t + 1) * Bp, :]
                + jnp.dot(h[0], whh0, preferred_element_type=jnp.float32))
            # Layers l>=1: fused input-projection + recurrence in ONE matmul.
            for l in range(1, nlayers):
                z = jnp.concatenate([h[l - 1], h[l]], axis=1)   # (Bp, 2*Hp)
                h[l] = jnp.tanh(
                    jnp.dot(z, wcats[l - 1],
                            preferred_element_type=jnp.float32)
                    + biases[l - 1])
            top_outs.append(h[nlayers - 1])

        # Top-layer sequence materialized once; lane-dense FC head.
        seq = jnp.concatenate(top_outs, axis=0)                  # (T*Bp, Hp)
        out_ref[...] = (
            jnp.dot(seq, wfc_ref[...], preferred_element_type=jnp.float32)
            + bfc_ref[...]
        )
        # Single coalesced store of all per-layer final hidden states.
        hidden_ref[...] = jnp.stack(h, axis=0)                   # (nl, Bp, Hp)

    return kernel


# ----------------------------------------------------------------------------
# Parameter packing (done ONCE, outside the jitted forward)
# ----------------------------------------------------------------------------
def _round_up(x: int, m: int) -> int:
    return (x + m - 1) // m * m


def prepare_params(params, nlayers, hiddensize, outputsize):
    """Transpose / pad / fuse the PyTorch-layout parameters into kernel form."""
    H, O = hiddensize, outputsize
    Hp = _round_up(max(H, 128), 128)
    Opad = _round_up(max(O, 128), 128)
    f32 = jnp.float32

    wih0 = params["weight_ih_l0"]                   # (H, F)
    F = wih0.shape[1]
    wih0_p = jnp.zeros((F, Hp), f32).at[:, :H].set(wih0.T.astype(f32))
    b0_p = jnp.zeros((1, Hp), f32).at[0, :H].set(
        (params["bias_ih_l0"] + params["bias_hh_l0"]).astype(f32))
    whh0_p = jnp.zeros((Hp, Hp), f32).at[:H, :H].set(
        params["weight_hh_l0"].T.astype(f32))
    packed = [wih0_p, b0_p, whh0_p]

    for l in range(1, nlayers):
        wih = params[f"weight_ih_l{l}"]             # (H, H)
        whh = params[f"weight_hh_l{l}"]             # (H, H)
        wcat = jnp.zeros((2 * Hp, Hp), f32)
        wcat = wcat.at[:H, :H].set(wih.T.astype(f32))          # rows for h_{l-1}
        wcat = wcat.at[Hp:Hp + H, :H].set(whh.T.astype(f32))   # rows for h_l
        b = jnp.zeros((1, Hp), f32).at[0, :H].set(
            (params[f"bias_ih_l{l}"] + params[f"bias_hh_l{l}"]).astype(f32))
        packed += [wcat, b]

    wfc_p = jnp.zeros((Hp, Opad), f32).at[:H, :O].set(
        params["fc_weight"].T.astype(f32))
    bfc_p = jnp.zeros((1, Opad), f32).at[0, :O].set(
        params["fc_bias"].astype(f32))
    packed += [wfc_p, bfc_p]
    return tuple(packed)


# ----------------------------------------------------------------------------
# Forward wrapper
# ----------------------------------------------------------------------------
@functools.partial(
    jax.jit, static_argnames=("nlayers", "hiddensize", "outputsize"))
def vowel_model_forward(x, packed, *, nlayers, hiddensize, outputsize):
    """Replicates VowelModel.forward.

    x: (B, T, F) float32 (batch_first, like PyTorch).
    packed: tuple from prepare_params (built once, reused across calls).
    Returns (out, hidden): out (B*T, outputsize), hidden (nlayers, B, hiddensize).
    """
    B, T, F = x.shape
    H, O = hiddensize, outputsize
    Hp = packed[2].shape[1]          # whh0_p is (Hp, Hp)
    Opad = packed[-1].shape[1]
    Bp = _round_up(max(B, 8), 8)     # full sublane tile

    # Time-major, batch-padded to (T*Bp, F); padded rows are zero and are
    # sliced away after the kernel (rows never mix in these matmuls).
    x_tm = jnp.transpose(x, (1, 0, 2)).astype(jnp.float32)      # (T, B, F)
    x_pad = jnp.zeros((T, Bp, F), jnp.float32).at[:, :B, :].set(x_tm)
    x_flat = x_pad.reshape(T * Bp, F)

    kernel = make_rnn_fc_kernel(nlayers, T, Bp)

    out_pad, hidden_pad = pl.pallas_call(
        kernel,
        out_shape=(
            jax.ShapeDtypeStruct((T * Bp, Opad), jnp.float32),
            jax.ShapeDtypeStruct((nlayers, Bp, Hp), jnp.float32),
        ),
        in_specs=[pl.BlockSpec(memory_space=pltpu.MemorySpace.VMEM)]
        * (1 + len(packed)),
        out_specs=(
            pl.BlockSpec(memory_space=pltpu.MemorySpace.VMEM),
            pl.BlockSpec(memory_space=pltpu.MemorySpace.VMEM),
        ),
    )(x_flat, *packed)

    # PyTorch: out.contiguous().view(-1, H) flattens (B, T) row-major, then fc
    # (fc is per-row, so applying it before the reorder is equivalent).
    out = (out_pad.reshape(T, Bp, Opad)[:, :B, :O]
           .transpose(1, 0, 2).reshape(B * T, O))
    hidden = hidden_pad[:, :B, :H]
    return out, hidden


# ----------------------------------------------------------------------------
# Deterministic parameter init (same shapes / init range as nn.RNN + nn.Linear)
# ----------------------------------------------------------------------------
def init_params(key, featuresize, hiddensize, outputsize, nlayers):
    params = {}
    bound = 1.0 / math.sqrt(hiddensize)
    for l in range(nlayers):
        in_l = featuresize if l == 0 else hiddensize
        key, k1, k2, k3, k4 = jax.random.split(key, 5)
        params[f"weight_ih_l{l}"] = jax.random.uniform(
            k1, (hiddensize, in_l), jnp.float32, -bound, bound)
        params[f"weight_hh_l{l}"] = jax.random.uniform(
            k2, (hiddensize, hiddensize), jnp.float32, -bound, bound)
        params[f"bias_ih_l{l}"] = jax.random.uniform(
            k3, (hiddensize,), jnp.float32, -bound, bound)
        params[f"bias_hh_l{l}"] = jax.random.uniform(
            k4, (hiddensize,), jnp.float32, -bound, bound)
    key, k1, k2 = jax.random.split(key, 3)
    params["fc_weight"] = jax.random.uniform(
        k1, (outputsize, hiddensize), jnp.float32, -bound, bound)
    params["fc_bias"] = jax.random.uniform(
        k2, (outputsize,), jnp.float32, -bound, bound)
    return params


# ----------------------------------------------------------------------------
# Pure-JAX reference (mirrors torch.nn.RNN(batch_first=True) + nn.Linear)
# ----------------------------------------------------------------------------
def ref_forward(x, params, nlayers, hiddensize):
    B, T, _ = x.shape
    inp = x
    finals = []
    for l in range(nlayers):
        wih = params[f"weight_ih_l{l}"]
        whh = params[f"weight_hh_l{l}"]
        bih = params[f"bias_ih_l{l}"]
        bhh = params[f"bias_hh_l{l}"]
        h = jnp.zeros((B, hiddensize), jnp.float32)
        outs = []
        for t in range(T):
            h = jnp.tanh(inp[:, t, :] @ wih.T + bih + h @ whh.T + bhh)
            outs.append(h)
        inp = jnp.stack(outs, axis=1)
        finals.append(h)
    out = inp.reshape(B * T, hiddensize) @ params["fc_weight"].T + params["fc_bias"]
    return out, jnp.stack(finals, axis=0)


# ----------------------------------------------------------------------------
if __name__ == "__main__":
    featuresize, hiddensize, outputsize, nlayers = 16, 32, 8, 2
    B, T = 2, 8
    vocab = ["a", "e", "i", "o", "u"]  # unused in forward()

    key = jax.random.PRNGKey(0)
    key, pkey, xkey = jax.random.split(key, 3)
    params = init_params(pkey, featuresize, hiddensize, outputsize, nlayers)
    x = jax.random.normal(xkey, (B, T, featuresize), jnp.float32)

    out_ref, hidden_ref = ref_forward(x, params, nlayers, hiddensize)

    # Pack / pad / transpose weights ONCE (not per forward call).
    packed = prepare_params(params, nlayers, hiddensize, outputsize)

    out, hidden = vowel_model_forward(
        x, packed, nlayers=nlayers, hiddensize=hiddensize,
        outputsize=outputsize)
    out = jax.block_until_ready(out)
    hidden = jax.block_until_ready(hidden)

    assert out.shape == (B * T, outputsize)
    assert hidden.shape == (nlayers, B, hiddensize)
    assert jnp.allclose(out, out_ref, atol=1e-4, rtol=1e-4)
    assert jnp.allclose(hidden, hidden_ref, atol=1e-4, rtol=1e-4)

    print("KERNEL_OK")
</pallas_src>

<mosaic_0001>
module attributes {stable_mosaic.version = 11 : i64} {
  func.func @kernel(%arg0: memref<64x16xf32, #tpu.memory_space<vmem>>, %arg1: memref<16x128xf32, #tpu.memory_space<vmem>>, %arg2: memref<1x128xf32, #tpu.memory_space<vmem>>, %arg3: memref<128x128xf32, #tpu.memory_space<vmem>>, %arg4: memref<256x128xf32, #tpu.memory_space<vmem>>, %arg5: memref<1x128xf32, #tpu.memory_space<vmem>>, %arg6: memref<128x128xf32, #tpu.memory_space<vmem>>, %arg7: memref<1x128xf32, #tpu.memory_space<vmem>>, %arg8: memref<64x128xf32, #tpu.memory_space<vmem>>, %arg9: memref<2x8x128xf32, #tpu.memory_space<vmem>>) attributes {dimension_semantics = [], scalar_prefetch = 0 : i64, scratch_operands = 0 : i64, tpu.core_type = #tpu.core_type<tc>} {
    %c0 = arith.constant 0 : index
    %c0_0 = arith.constant 0 : index
    %0 = vector.load %arg0[%c0, %c0_0] : memref<64x16xf32, #tpu.memory_space<vmem>>, vector<64x16xf32>
    %c0_1 = arith.constant 0 : index
    %c0_2 = arith.constant 0 : index
    %1 = vector.load %arg1[%c0_1, %c0_2] : memref<16x128xf32, #tpu.memory_space<vmem>>, vector<16x128xf32>
    %cst = arith.constant dense<0.000000e+00> : vector<64x128xf32>
    %2 = tpu.matmul %0, %1, %cst {dimension_numbers = #tpu.dot_dimension_numbers<[1], [0], [0], [1], [0, 0, 1, 1], [], []>} : vector<64x16xf32>, vector<16x128xf32>, vector<64x128xf32> -> vector<64x128xf32>
    %c0_3 = arith.constant 0 : index
    %c0_4 = arith.constant 0 : index
    %3 = vector.load %arg2[%c0_3, %c0_4] : memref<1x128xf32, #tpu.memory_space<vmem>>, vector<1x128xf32>
    %4 = vector.broadcast %3 : vector<1x128xf32> to vector<64x128xf32>
    %5 = arith.addf %2, %4 : vector<64x128xf32>
    %c0_5 = arith.constant 0 : index
    %c0_6 = arith.constant 0 : index
    %6 = vector.load %arg3[%c0_5, %c0_6] : memref<128x128xf32, #tpu.memory_space<vmem>>, vector<128x128xf32>
    %c0_7 = arith.constant 0 : index
    %c0_8 = arith.constant 0 : index
    %7 = vector.load %arg4[%c0_7, %c0_8] : memref<256x128xf32, #tpu.memory_space<vmem>>, vector<256x128xf32>
    %c0_9 = arith.constant 0 : index
    %c0_10 = arith.constant 0 : index
    %8 = vector.load %arg5[%c0_9, %c0_10] : memref<1x128xf32, #tpu.memory_space<vmem>>, vector<1x128xf32>
    %cst_11 = arith.constant 0.000000e+00 : f32
    %9 = vector.broadcast %cst_11 : f32 to vector<8x128xf32>
    %cst_12 = arith.constant 0.000000e+00 : f32
    %10 = vector.broadcast %cst_12 : f32 to vector<8x128xf32>
    %11 = vector.extract_strided_slice %5 {offsets = [0, 0], sizes = [8, 128], strides = [1, 1]} : vector<64x128xf32> to vector<8x128xf32>
    %cst_13 = arith.constant dense<0.000000e+00> : vector<8x128xf32>
    %12 = tpu.matmul %9, %6, %cst_13 {dimension_numbers = #tpu.dot_dimension_numbers<[1], [0], [0], [1], [0, 0, 1, 1], [], []>} : vector<8x128xf32>, vector<128x128xf32>, vector<8x128xf32> -> vector<8x128xf32>
    %13 = arith.addf %11, %12 : vector<8x128xf32>
    %14 = math.tanh %13 : vector<8x128xf32>
    %15 = tpu.concatenate %14, %10 in 1 : vector<8x128xf32>, vector<8x128xf32> -> vector<8x256xf32>
    %cst_14 = arith.constant dense<0.000000e+00> : vector<8x128xf32>
    %16 = tpu.matmul %15, %7, %cst_14 {dimension_numbers = #tpu.dot_dimension_numbers<[1], [0], [0], [1], [0, 0, 1, 1], [], []>} : vector<8x256xf32>, vector<256x128xf32>, vector<8x128xf32> -> vector<8x128xf32>
    %17 = vector.broadcast %8 : vector<1x128xf32> to vector<8x128xf32>
    %18 = arith.addf %16, %17 : vector<8x128xf32>
    %19 = math.tanh %18 : vector<8x128xf32>
    %20 = vector.extract_strided_slice %5 {offsets = [8, 0], sizes = [8, 128], strides = [1, 1]} : vector<64x128xf32> to vector<8x128xf32>
    %cst_15 = arith.constant dense<0.000000e+00> : vector<8x128xf32>
    %21 = tpu.matmul %14, %6, %cst_15 {dimension_numbers = #tpu.dot_dimension_numbers<[1], [0], [0], [1], [0, 0, 1, 1], [], []>} : vector<8x128xf32>, vector<128x128xf32>, vector<8x128xf32> -> vector<8x128xf32>
    %22 = arith.addf %20, %21 : vector<8x128xf32>
    %23 = math.tanh %22 : vector<8x128xf32>
    %24 = tpu.concatenate %23, %19 in 1 : vector<8x128xf32>, vector<8x128xf32> -> vector<8x256xf32>
    %cst_16 = arith.constant dense<0.000000e+00> : vector<8x128xf32>
    %25 = tpu.matmul %24, %7, %cst_16 {dimension_numbers = #tpu.dot_dimension_numbers<[1], [0], [0], [1], [0, 0, 1, 1], [], []>} : vector<8x256xf32>, vector<256x128xf32>, vector<8x128xf32> -> vector<8x128xf32>
    %26 = vector.broadcast %8 : vector<1x128xf32> to vector<8x128xf32>
    %27 = arith.addf %25, %26 : vector<8x128xf32>
    %28 = math.tanh %27 : vector<8x128xf32>
    %29 = vector.extract_strided_slice %5 {offsets = [16, 0], sizes = [8, 128], strides = [1, 1]} : vector<64x128xf32> to vector<8x128xf32>
    %cst_17 = arith.constant dense<0.000000e+00> : vector<8x128xf32>
    %30 = tpu.matmul %23, %6, %cst_17 {dimension_numbers = #tpu.dot_dimension_numbers<[1], [0], [0], [1], [0, 0, 1, 1], [], []>} : vector<8x128xf32>, vector<128x128xf32>, vector<8x128xf32> -> vector<8x128xf32>
    %31 = arith.addf %29, %30 : vector<8x128xf32>
    %32 = math.tanh %31 : vector<8x128xf32>
    %33 = tpu.concatenate %32, %28 in 1 : vector<8x128xf32>, vector<8x128xf32> -> vector<8x256xf32>
    %cst_18 = arith.constant dense<0.000000e+00> : vector<8x128xf32>
    %34 = tpu.matmul %33, %7, %cst_18 {dimension_numbers = #tpu.dot_dimension_numbers<[1], [0], [0], [1], [0, 0, 1, 1], [], []>} : vector<8x256xf32>, vector<256x128xf32>, vector<8x128xf32> -> vector<8x128xf32>
    %35 = vector.broadcast %8 : vector<1x128xf32> to vector<8x128xf32>
    %36 = arith.addf %34, %35 : vector<8x128xf32>
    %37 = math.tanh %36 : vector<8x128xf32>
    %38 = vector.extract_strided_slice %5 {offsets = [24, 0], sizes = [8, 128], strides = [1, 1]} : vector<64x128xf32> to vector<8x128xf32>
    %cst_19 = arith.constant dense<0.000000e+00> : vector<8x128xf32>
    %39 = tpu.matmul %32, %6, %cst_19 {dimension_numbers = #tpu.dot_dimension_numbers<[1], [0], [0], [1], [0, 0, 1, 1], [], []>} : vector<8x128xf32>, vector<128x128xf32>, vector<8x128xf32> -> vector<8x128xf32>
    %40 = arith.addf %38, %39 : vector<8x128xf32>
    %41 = math.tanh %40 : vector<8x128xf32>
    %42 = tpu.concatenate %41, %37 in 1 : vector<8x128xf32>, vector<8x128xf32> -> vector<8x256xf32>
    %cst_20 = arith.constant dense<0.000000e+00> : vector<8x128xf32>
    %43 = tpu.matmul %42, %7, %cst_20 {dimension_numbers = #tpu.dot_dimension_numbers<[1], [0], [0], [1], [0, 0, 1, 1], [], []>} : vector<8x256xf32>, vector<256x128xf32>, vector<8x128xf32> -> vector<8x128xf32>
    %44 = vector.broadcast %8 : vector<1x128xf32> to vector<8x128xf32>
    %45 = arith.addf %43, %44 : vector<8x128xf32>
    %46 = math.tanh %45 : vector<8x128xf32>
    %47 = vector.extract_strided_slice %5 {offsets = [32, 0], sizes = [8, 128], strides = [1, 1]} : vector<64x128xf32> to vector<8x128xf32>
    %cst_21 = arith.constant dense<0.000000e+00> : vector<8x128xf32>
    %48 = tpu.matmul %41, %6, %cst_21 {dimension_numbers = #tpu.dot_dimension_numbers<[1], [0], [0], [1], [0, 0, 1, 1], [], []>} : vector<8x128xf32>, vector<128x128xf32>, vector<8x128xf32> -> vector<8x128xf32>
    %49 = arith.addf %47, %48 : vector<8x128xf32>
    %50 = math.tanh %49 : vector<8x128xf32>
    %51 = tpu.concatenate %50, %46 in 1 : vector<8x128xf32>, vector<8x128xf32> -> vector<8x256xf32>
    %cst_22 = arith.constant dense<0.000000e+00> : vector<8x128xf32>
    %52 = tpu.matmul %51, %7, %cst_22 {dimension_numbers = #tpu.dot_dimension_numbers<[1], [0], [0], [1], [0, 0, 1, 1], [], []>} : vector<8x256xf32>, vector<256x128xf32>, vector<8x128xf32> -> vector<8x128xf32>
    %53 = vector.broadcast %8 : vector<1x128xf32> to vector<8x128xf32>
    %54 = arith.addf %52, %53 : vector<8x128xf32>
    %55 = math.tanh %54 : vector<8x128xf32>
    %56 = vector.extract_strided_slice %5 {offsets = [40, 0], sizes = [8, 128], strides = [1, 1]} : vector<64x128xf32> to vector<8x128xf32>
    %cst_23 = arith.constant dense<0.000000e+00> : vector<8x128xf32>
    %57 = tpu.matmul %50, %6, %cst_23 {dimension_numbers = #tpu.dot_dimension_numbers<[1], [0], [0], [1], [0, 0, 1, 1], [], []>} : vector<8x128xf32>, vector<128x128xf32>, vector<8x128xf32> -> vector<8x128xf32>
    %58 = arith.addf %56, %57 : vector<8x128xf32>
    %59 = math.tanh %58 : vector<8x128xf32>
    %60 = tpu.concatenate %59, %55 in 1 : vector<8x128xf32>, vector<8x128xf32> -> vector<8x256xf32>
    %cst_24 = arith.constant dense<0.000000e+00> : vector<8x128xf32>
    %61 = tpu.matmul %60, %7, %cst_24 {dimension_numbers = #tpu.dot_dimension_numbers<[1], [0], [0], [1], [0, 0, 1, 1], [], []>} : vector<8x256xf32>, vector<256x128xf32>, vector<8x128xf32> -> vector<8x128xf32>
    %62 = vector.broadcast %8 : vector<1x128xf32> to vector<8x128xf32>
    %63 = arith.addf %61, %62 : vector<8x128xf32>
    %64 = math.tanh %63 : vector<8x128xf32>
    %65 = vector.extract_strided_slice %5 {offsets = [48, 0], sizes = [8, 128], strides = [1, 1]} : vector<64x128xf32> to vector<8x128xf32>
    %cst_25 = arith.constant dense<0.000000e+00> : vector<8x128xf32>
    %66 = tpu.matmul %59, %6, %cst_25 {dimension_numbers = #tpu.dot_dimension_numbers<[1], [0], [0], [1], [0, 0, 1, 1], [], []>} : vector<8x128xf32>, vector<128x128xf32>, vector<8x128xf32> -> vector<8x128xf32>
    %67 = arith.addf %65, %66 : vector<8x128xf32>
    %68 = math.tanh %67 : vector<8x128xf32>
    %69 = tpu.concatenate %68, %64 in 1 : vector<8x128xf32>, vector<8x128xf32> -> vector<8x256xf32>
    %cst_26 = arith.constant dense<0.000000e+00> : vector<8x128xf32>
    %70 = tpu.matmul %69, %7, %cst_26 {dimension_numbers = #tpu.dot_dimension_numbers<[1], [0], [0], [1], [0, 0, 1, 1], [], []>} : vector<8x256xf32>, vector<256x128xf32>, vector<8x128xf32> -> vector<8x128xf32>
    %71 = vector.broadcast %8 : vector<1x128xf32> to vector<8x128xf32>
    %72 = arith.addf %70, %71 : vector<8x128xf32>
    %73 = math.tanh %72 : vector<8x128xf32>
    %74 = vector.extract_strided_slice %5 {offsets = [56, 0], sizes = [8, 128], strides = [1, 1]} : vector<64x128xf32> to vector<8x128xf32>
    %cst_27 = arith.constant dense<0.000000e+00> : vector<8x128xf32>
    %75 = tpu.matmul %68, %6, %cst_27 {dimension_numbers = #tpu.dot_dimension_numbers<[1], [0], [0], [1], [0, 0, 1, 1], [], []>} : vector<8x128xf32>, vector<128x128xf32>, vector<8x128xf32> -> vector<8x128xf32>
    %76 = arith.addf %74, %75 : vector<8x128xf32>
    %77 = math.tanh %76 : vector<8x128xf32>
    %78 = tpu.concatenate %77, %73 in 1 : vector<8x128xf32>, vector<8x128xf32> -> vector<8x256xf32>
    %cst_28 = arith.constant dense<0.000000e+00> : vector<8x128xf32>
    %79 = tpu.matmul %78, %7, %cst_28 {dimension_numbers = #tpu.dot_dimension_numbers<[1], [0], [0], [1], [0, 0, 1, 1], [], []>} : vector<8x256xf32>, vector<256x128xf32>, vector<8x128xf32> -> vector<8x128xf32>
    %80 = vector.broadcast %8 : vector<1x128xf32> to vector<8x128xf32>
    %81 = arith.addf %79, %80 : vector<8x128xf32>
    %82 = math.tanh %81 : vector<8x128xf32>
    %83 = tpu.concatenate %19, %28, %37, %46, %55, %64, %73, %82 in 0 : vector<8x128xf32>, vector<8x128xf32>, vector<8x128xf32>, vector<8x128xf32>, vector<8x128xf32>, vector<8x128xf32>, vector<8x128xf32>, vector<8x128xf32> -> vector<64x128xf32>
    %c0_29 = arith.constant 0 : index
    %c0_30 = arith.constant 0 : index
    %84 = vector.load %arg6[%c0_29, %c0_30] : memref<128x128xf32, #tpu.memory_space<vmem>>, vector<128x128xf32>
    %cst_31 = arith.constant dense<0.000000e+00> : vector<64x128xf32>
    %85 = tpu.matmul %83, %84, %cst_31 {dimension_numbers = #tpu.dot_dimension_numbers<[1], [0], [0], [1], [0, 0, 1, 1], [], []>} : vector<64x128xf32>, vector<128x128xf32>, vector<64x128xf32> -> vector<64x128xf32>
    %c0_32 = arith.constant 0 : index
    %c0_33 = arith.constant 0 : index
    %86 = vector.load %arg7[%c0_32, %c0_33] : memref<1x128xf32, #tpu.memory_space<vmem>>, vector<1x128xf32>
    %87 = vector.broadcast %86 : vector<1x128xf32> to vector<64x128xf32>
    %88 = arith.addf %85, %87 : vector<64x128xf32>
    %c0_34 = arith.constant 0 : index
    %c0_35 = arith.constant 0 : index
    %89 = vector.load %arg8[%c0_34, %c0_35] : memref<64x128xf32, #tpu.memory_space<vmem>>, vector<64x128xf32>
    tpu.vector_store %arg8[%c0_34, %c0_35], %88 {strides = array<i32>} : memref<64x128xf32, #tpu.memory_space<vmem>>, vector<64x128xf32>,
    %90 = vector.shape_cast %77 : vector<8x128xf32> to vector<1x8x128xf32>
    %91 = vector.shape_cast %82 : vector<8x128xf32> to vector<1x8x128xf32>
    %92 = tpu.concatenate %90, %91 in 0 : vector<1x8x128xf32>, vector<1x8x128xf32> -> vector<2x8x128xf32>
    %c0_36 = arith.constant 0 : index
    %c0_37 = arith.constant 0 : index
    %c0_38 = arith.constant 0 : index
    %93 = vector.load %arg9[%c0_36, %c0_37, %c0_38] : memref<2x8x128xf32, #tpu.memory_space<vmem>>, vector<2x8x128xf32>
    tpu.vector_store %arg9[%c0_36, %c0_37, %c0_38], %92 {strides = array<i32>} : memref<2x8x128xf32, #tpu.memory_space<vmem>>, vector<2x8x128xf32>,
    return
  }
}

</mosaic_0001>

<bundles_post_ra>
// kernel: vowel_model_forward.1
= control target key start
LH: loop header
LB: loop body
LE: loop exit
PB: predicated region body
PF: predicated region fallthrough
CT: control target
= control target key end

     0   :  { %15 = vsyncpa [#allocation3], 0  ;;  %s1597_s0 = inlined_call_operand.vmem [shape: f32[64,16], index: 0, kind: input, shape index: {}]   ;;  %s1598_s1 = inlined_call_operand.vmem [shape: f32[16,128], index: 1, kind: input, shape index: {}]   ;;  %s1599_s2 = inlined_call_operand.vmem [shape: f32[1,128], index: 2, kind: input, shape index: {}]   ;;  %s1600_s3 = inlined_call_operand.hbm [shape: f32[128,128], index: 3, kind: input, shape index: {}]   ;;  %s1601_s4 = inlined_call_operand.hbm [shape: f32[256,128], index: 4, kind: input, shape index: {}]   ;;  %s1602_s5 = inlined_call_operand.vmem [shape: f32[1,128], index: 5, kind: input, shape index: {}]   ;;  %s1603_s6 = inlined_call_operand.hbm [shape: f32[128,128], index: 6, kind: input, shape index: {}]   ;;  %s1604_s7 = inlined_call_operand.vmem [shape: f32[1,128], index: 7, kind: input, shape index: {}]   ;;  %s1605_s8 = inlined_call_operand.vmem [shape: f32[64,128], index: 8, kind: output, shape index: {0}]   ;;  %s1606_s9 = inlined_call_operand.vmem [shape: f32[2,8,128], index: 9, kind: output, shape index: {1}]  }
   0x1   :  { %16 = vsyncpa [#allocation5], 0  ;;  %s40_s11 = sshll.u32 %s1601_s4, 4  ;;  %s922_s12 = smov [#allocation4]   ;;  %s41_s11 = int_to_ptr.hbm [resolvable:$true] %s40_s11 }
   0x2   :  { %s42_s13 = sshll.u32 %s922_s12, 4  ;;  %s27_s16 = sshll.u32 %s1600_s3, 4  ;;  %s43_s13 = int_to_ptr.vmem [resolvable:$true] %s42_s13  ;;  %s28_s16 = int_to_ptr.hbm [resolvable:$true] %s27_s16 }
   0x3   :  { %s923_s17 = smov 128   ;;  %s924_s18 = smov 8  }
   0x4   :  { %48 = dma.hbm_to_vmem [thread:$0]  %s41_s11, 4096, %s43_s13, [#allocation5], %s923_s17, %s923_s17, %s924_s18  }
   0x5   :  { %s925_s19 = smov [#allocation2]   ;;  %s55_s23 = sshll.u32 %s1603_s6, 4  ;;  %s56_s23 = int_to_ptr.hbm [resolvable:$true] %s55_s23 }
   0x6   :  { %s29_s20 = sshll.u32 %s925_s19, 4  ;;  %s926_s4 = smov [#allocation6]   ;;  %s30_s20 = int_to_ptr.vmem [resolvable:$true] %s29_s20 }
   0x7   :  { %35 = dma.hbm_to_vmem [thread:$0]  %s28_s16, 2048, %s30_s20, [#allocation3], %s923_s17, %s923_s17, %s924_s18  }
   0x8   :  { %s57_s24 = sshll.u32 %s926_s4, 4  ;;  %s58_s24 = int_to_ptr.vmem [resolvable:$true] %s57_s24 }
   0x9   :  { %63 = dma.hbm_to_vmem [thread:$0]  %s56_s23, 2048, %s58_s24, [#allocation5], %s923_s17, %s923_s17, %s924_s18  }
   0xa   :  { %918 = dma.done.wait [#allocation3], 2048  }
   0xb   :  { %919 = vsyncadd [#allocation3], 4294965248 }
   0xc   :  { %920 = dma.done.wait [#allocation5], 6144  }
   0xd   :  { %921 = vsyncadd [#allocation5], 4294961152  ;;  %v987_v0 = vld [vmem:[#allocation2 + $0x78] sm:$0xff]  ;;  %v989_v1 = vld [vmem:[#allocation2 + $0x70] sm:$0xff]  ;;  %vm92_vm0 = vcmask 130048   ;;  %v927_v39 = vmov 0.0  }
   0xe   :  { %207 = vmatpush.msra.mxu1 %v987_v0  ;;  %v992_v2 = vld [vmem:[#allocation2 + $0x68] sm:$0xff]  ;;  %v995_v3 = vld [vmem:[#allocation2 + $0x60] sm:$0xff]  ;;  %v1007_v7 = vld [vmem:[#allocation2 + $0x58] sm:$0xff] }
   0xf   :  { %v87_v4 = vld [vmem:[%s1598_s1 + $0x8] sm:$0xff]  ;;  %v86_v5 = vld [vmem:[%s1598_s1] sm:$0xff]  ;;  %v1009_v8 = vld [vmem:[#allocation4 + $0x78] sm:$0xff] }
  0x10   :  { %208 = vmatpush.msra.mxu1 %v989_v1  ;;  %131 = vmatpush.msra.mxu0 %v87_v4  ;;  %v78_v6 = vld [vmem:[%s1597_s0] sm:$0xff]  ;;  %v1012_v9 = vld [vmem:[#allocation4 + $0x70] sm:$0xff]  ;;  %v1019_v11 = vld [vmem:[#allocation4 + $0x68] sm:$0xff] }
  0x11   :  { %803 = vmatpush.msra.mxu2 %v87_v4  ;;  %v1014_v10 = vld [vmem:[#allocation2 + $0x50] sm:$0xff]  ;;  %232 = vmatpush.msra.mxu3 %v1009_v8  ;;  %v1022_v12 = vld [vmem:[#allocation2 + $0x48] sm:$0xff]  ;;  %v1026_v13 = vld [vmem:[#allocation4 + $0x60] sm:$0xff] }
  0x12   :  { %209 = vmatpush.msra.mxu1 %v992_v2  ;;  %132 = vmatpush.msra.mxu0 %v86_v5  ;;  %v1028_v14 = vld [vmem:[#allocation4 + $0xf8] sm:$0xff]  ;;  %v1031_v15 = vld [vmem:[#allocation2 + $0x40] sm:$0xff]  ;;  %v1038_v17 = vld [vmem:[#allocation4 + $0xf0] sm:$0xff] }
  0x13   :  { %795 = vmatmul.msk.f32.vlgmr.msra.gmra.mxu0 %vm92_vm0, %v78_v6  ;;  %233 = vmatpush.msra.mxu3 %v1012_v9  ;;  %v1034_v16 = vld [vmem:[#allocation4 + $0x58] sm:$0xff]  ;;  %v1046_v19 = vld [vmem:[#allocation4 + $0x50] sm:$0xff]  ;;  %v1048_v20 = vld [vmem:[#allocation4 + $0xe8] sm:$0xff] }
  0x14   :  { %210 = vmatpush.msra.mxu1 %v995_v3  ;;  %295 = vmatpush.msrb.mxu0 %v1009_v8  ;;  %v1041_v18 = vld [vmem:[#allocation2 + $0x38] sm:$0xff]  ;;  %v1051_v21 = vld [vmem:[#allocation2 + $0x30] sm:$0xff]  ;;  %v1056_v22 = vld [vmem:[#allocation4 + $0x48] sm:$0xff] }
  0x15   :  { %804 = vmatpush.msra.mxu2 %v86_v5  ;;  %234 = vmatpush.msra.mxu3 %v1019_v11  ;;  %v1058_v23 = vld [vmem:[#allocation4 + $0xe0] sm:$0xff]  ;;  %v1061_v24 = vld [vmem:[#allocation2 + $0x28] sm:$0xff]  ;;  %v1068_v26 = vld [vmem:[#allocation4 + $0xd8] sm:$0xff] }
  0x16   :  { %211 = vmatpush.msra.mxu1 %v1007_v7  ;;  %296 = vmatpush.msrb.mxu0 %v1012_v9  ;;  %v1066_v25 = vld [vmem:[#allocation4 + $0x40] sm:$0xff]  ;;  %v1076_v28 = vld [vmem:[#allocation4 + $0x38] sm:$0xff]  ;;  %v1078_v29 = vld [vmem:[#allocation4 + $0xd0] sm:$0xff] }
  0x17   :  { %378 = vmatpush.msrb.mxu2 %v1028_v14  ;;  %235 = vmatpush.msra.mxu3 %v1026_v13  ;;  %v1071_v27 = vld [vmem:[#allocation2 + $0x20] sm:$0xff]  ;;  %v1081_v30 = vld [vmem:[#allocation2 + $0x18] sm:$0xff]  ;;  %v1086_v31 = vld [vmem:[#allocation4 + $0x30] sm:$0xff] }
  0x18   :  { %212 = vmatpush.msra.mxu1 %v1014_v10  ;;  %297 = vmatpush.msrb.mxu0 %v1019_v11  ;;  %v1089_v32 = vld [vmem:[#allocation2 + $0x10] sm:$0xff]  ;;  %v1093_v33 = vld [vmem:[#allocation4 + $0x28] sm:$0xff]  ;;  %v1100_v35 = vld [vmem:[#allocation4 + $0x20] sm:$0xff] }
  0x19   :  { %379 = vmatpush.msrb.mxu2 %v1038_v17  ;;  %236 = vmatpush.msra.mxu3 %v1034_v16  ;;  %v1096_v34 = vld [vmem:[#allocation2 + $0x8] sm:$0xff]  ;;  %v1103_v36 = vld [vmem:[#allocation2] sm:$0xff]  ;;  %v1107_v37 = vld [vmem:[#allocation4 + $0x18] sm:$0xff] }
  0x1a   :  { %213 = vmatpush.msra.mxu1 %v1022_v12  ;;  %298 = vmatpush.msrb.mxu0 %v1026_v13  ;;  %v1112_v38 = vld [vmem:[#allocation4 + $0x10] sm:$0xff]  ;;  %v1118_v40 = vld [vmem:[#allocation4 + $0x8] sm:$0xff]  ;;  %v1123_v41 = vld [vmem:[#allocation4] sm:$0xff] }
  0x1b   :  { %380 = vmatpush.msrb.mxu2 %v1048_v20  ;;  %237 = vmatpush.msra.mxu3 %v1046_v19  ;;  %v1182_v42 = vld [vmem:[#allocation4 + $0xc8] sm:$0xff]  ;;  %v1186_v43 = vld [vmem:[#allocation4 + $0xc0] sm:$0xff]  ;;  %v1190_v44 = vld [vmem:[#allocation4 + $0xb8] sm:$0xff] }
  0x1c   :  { %214 = vmatpush.msra.mxu1 %v1031_v15  ;;  %299 = vmatpush.msrb.mxu0 %v1034_v16  ;;  %v1193_v45 = vld [vmem:[#allocation4 + $0xb0] sm:$0xff]  ;;  %v79_v46 = vld [vmem:[%s1597_s0 + $0x8] sm:$0xff]  ;;  %v1204_v48 = vld [vmem:[#allocation4 + $0xa0] sm:$0xff] }
  0x1d   :  { %381 = vmatpush.msrb.mxu2 %v1058_v23  ;;  %238 = vmatpush.msra.mxu3 %v1056_v22  ;;  %v1199_v47 = vld [vmem:[#allocation4 + $0xa8] sm:$0xff]  ;;  %v1210_v49 = vld [vmem:[#allocation4 + $0x98] sm:$0xff]  ;;  %v1212_v50 = vld [vmem:[#allocation4 + $0x90] sm:$0xff] }
  0x1e   :  { %215 = vmatpush.msra.mxu1 %v1041_v18  ;;  %300 = vmatpush.msrb.mxu0 %v1046_v19  ;;  %v1216_v51 = vld [vmem:[#allocation4 + $0x88] sm:$0xff]  ;;  %v1220_v52 = vld [vmem:[#allocation4 + $0x80] sm:$0xff]  ;;  %v80_v53 = vld [vmem:[%s1597_s0 + $0x10] sm:$0xff] }
  0x1f   :  { %382 = vmatpush.msrb.mxu2 %v1068_v26  ;;  %239 = vmatpush.msra.mxu3 %v1066_v25  ;;  %v1233_v54 = vld [vmem:[%s1599_s2] ss:$0 sm:$0xff]  ;;  %v81_v60 = vld [vmem:[%s1597_s0 + $0x18] sm:$0xff] }
  0x20   :  { %216 = vmatpush.msra.mxu1 %v1051_v21  ;;  %301 = vmatpush.msrb.mxu0 %v1056_v22 }
  0x21   :  { %383 = vmatpush.msrb.mxu2 %v1078_v29  ;;  %240 = vmatpush.msra.mxu3 %v1076_v28 }
  0x22   :  { %217 = vmatpush.msra.mxu1 %v1061_v24  ;;  %302 = vmatpush.msrb.mxu0 %v1066_v25 }
  0x23   :  { %241 = vmatpush.msra.mxu3 %v1086_v31  ;;  %384 = vmatpush.msrb.mxu2 %v1182_v42 }
  0x24   :  { %218 = vmatpush.msra.mxu1 %v1071_v27  ;;  %303 = vmatpush.msrb.mxu0 %v1076_v28 }
  0x25   :  { %242 = vmatpush.msra.mxu3 %v1093_v33  ;;  %385 = vmatpush.msrb.mxu2 %v1186_v43 }
  0x26   :  { %219 = vmatpush.msra.mxu1 %v1081_v30  ;;  %304 = vmatpush.msrb.mxu0 %v1086_v31 }
  0x27   :  { %243 = vmatpush.msra.mxu3 %v1100_v35  ;;  %386 = vmatpush.msrb.mxu2 %v1190_v44 }
  0x28   :  { %220 = vmatpush.msra.mxu1 %v1089_v32  ;;  %305 = vmatpush.msrb.mxu0 %v1093_v33 }
  0x29   :  { %244 = vmatpush.msra.mxu3 %v1107_v37  ;;  %796 = vmatmul.msk.f32.gmra.mxu0 %vm92_vm0, %v79_v46 }
  0x2a   :  { %221 = vmatpush.msra.mxu1 %v1096_v34  ;;  %306 = vmatpush.msrb.mxu0 %v1100_v35 }
  0x2b   :  { %245 = vmatpush.msra.mxu3 %v1112_v38  ;;  %387 = vmatpush.msrb.mxu2 %v1193_v45 }
  0x2c   :  { %222 = vmatpush.msra.mxu1 %v1103_v36  ;;  %307 = vmatpush.msrb.mxu0 %v1107_v37 }
  0x2d   :  { %223 = vmatmul.f32.vlgmr.msra.gmra.mxu1 %v927_v39  ;;  %246 = vmatpush.msra.mxu3 %v1118_v40 }
  0x2e   :  { %273 = vmatpush.msrb.mxu1 %v987_v0  ;;  %308 = vmatpush.msrb.mxu0 %v1112_v38 }
  0x2f   :  { %247 = vmatpush.msra.mxu3 %v1123_v41  ;;  %388 = vmatpush.msrb.mxu2 %v1199_v47 }
  0x30   :  { %274 = vmatpush.msrb.mxu1 %v989_v1  ;;  %309 = vmatpush.msrb.mxu0 %v1118_v40 }
  0x31   :  { %252 = vmatpush.msrb.mxu3 %v1028_v14  ;;  %389 = vmatpush.msrb.mxu2 %v1204_v48 }
  0x32   :  { %275 = vmatpush.msrb.mxu1 %v992_v2  ;;  %310 = vmatpush.msrb.mxu0 %v1123_v41 }
  0x33   :  { %253 = vmatpush.msrb.mxu3 %v1038_v17  ;;  %390 = vmatpush.msrb.mxu2 %v1210_v49 }
  0x34   :  { %276 = vmatpush.msrb.mxu1 %v995_v3  ;;  %336 = vmatpush.msra.mxu0 %v987_v0 }
  0x35   :  { %254 = vmatpush.msrb.mxu3 %v1048_v20  ;;  %391 = vmatpush.msrb.mxu2 %v1212_v50 }
  0x36   :  { %277 = vmatpush.msrb.mxu1 %v1007_v7  ;;  %337 = vmatpush.msra.mxu0 %v989_v1 }
  0x37   :  { %255 = vmatpush.msrb.mxu3 %v1058_v23  ;;  %392 = vmatpush.msrb.mxu2 %v1216_v51 }
  0x38   :  { %278 = vmatpush.msrb.mxu1 %v1014_v10  ;;  %338 = vmatpush.msra.mxu0 %v992_v2 }
  0x39   :  { %256 = vmatpush.msrb.mxu3 %v1068_v26  ;;  %393 = vmatpush.msrb.mxu2 %v1220_v52 }
  0x3a   :  { %279 = vmatpush.msrb.mxu1 %v1022_v12  ;;  %339 = vmatpush.msra.mxu0 %v995_v3 }
  0x3b   :  { %257 = vmatpush.msrb.mxu3 %v1078_v29  ;;  %797 = vmatmul.msk.f32.gmra.mxu0 %vm92_vm0, %v80_v53 }
  0x3c   :  { %280 = vmatpush.msrb.mxu1 %v1031_v15  ;;  %340 = vmatpush.msra.mxu0 %v1007_v7 }
  0x3d   :  { %258 = vmatpush.msrb.mxu3 %v1182_v42 }
  0x3e   :  { %281 = vmatpush.msrb.mxu1 %v1041_v18  ;;  %341 = vmatpush.msra.mxu0 %v1014_v10 }
  0x3f   :  { %259 = vmatpush.msrb.mxu3 %v1186_v43 }
  0x40   :  { %282 = vmatpush.msrb.mxu1 %v1051_v21  ;;  %342 = vmatpush.msra.mxu0 %v1022_v12 }
  0x41   :  { %260 = vmatpush.msrb.mxu3 %v1190_v44 }
  0x42   :  { %283 = vmatpush.msrb.mxu1 %v1061_v24  ;;  %343 = vmatpush.msra.mxu0 %v1031_v15 }
  0x43   :  { %261 = vmatpush.msrb.mxu3 %v1193_v45  ;;  %798 = vmatmul.msk.f32.gmra.mxu0 %vm92_vm0, %v81_v60 }
  0x44   :  { %284 = vmatpush.msrb.mxu1 %v1071_v27  ;;  %344 = vmatpush.msra.mxu0 %v1041_v18 }
  0x45   :  { %262 = vmatpush.msrb.mxu3 %v1199_v47 }
  0x46   :  { %285 = vmatpush.msrb.mxu1 %v1081_v30  ;;  %345 = vmatpush.msra.mxu0 %v1051_v21 }
  0x47   :  { %263 = vmatpush.msrb.mxu3 %v1204_v48 }
  0x48   :  { %286 = vmatpush.msrb.mxu1 %v1089_v32  ;;  %346 = vmatpush.msra.mxu0 %v1061_v24 }
  0x49   :  { %264 = vmatpush.msrb.mxu3 %v1210_v49 }
  0x4a   :  { %287 = vmatpush.msrb.mxu1 %v1096_v34  ;;  %347 = vmatpush.msra.mxu0 %v1071_v27 }
  0x4b   :  { %265 = vmatpush.msrb.mxu3 %v1212_v50 }
  0x4c   :  { %288 = vmatpush.msrb.mxu1 %v1103_v36  ;;  %348 = vmatpush.msra.mxu0 %v1081_v30 }
  0x4d   :  { %266 = vmatpush.msrb.mxu3 %v1216_v51 }
  0x4e   :  { %358 = vmatpush.msra.mxu1 %v1009_v8  ;;  %349 = vmatpush.msra.mxu0 %v1089_v32 }
  0x4f   :  { %267 = vmatpush.msrb.mxu3 %v1220_v52 }
  0x50   :  { %359 = vmatpush.msra.mxu1 %v1012_v9  ;;  %350 = vmatpush.msra.mxu0 %v1096_v34 }
  0x52   :  { %360 = vmatpush.msra.mxu1 %v1019_v11  ;;  %351 = vmatpush.msra.mxu0 %v1103_v36 }
  0x54   :  { %361 = vmatpush.msra.mxu1 %v1026_v13 }
  0x56   :  { %362 = vmatpush.msra.mxu1 %v1034_v16 }
  0x58   :  { %363 = vmatpush.msra.mxu1 %v1046_v19 }
  0x5a   :  { %364 = vmatpush.msra.mxu1 %v1056_v22 }
  0x5c   :  { %365 = vmatpush.msra.mxu1 %v1066_v25 }
  0x5e   :  { %366 = vmatpush.msra.mxu1 %v1076_v28 }
  0x60   :  { %367 = vmatpush.msra.mxu1 %v1086_v31 }
  0x62   :  { %368 = vmatpush.msra.mxu1 %v1093_v33 }
  0x64   :  { %369 = vmatpush.msra.mxu1 %v1100_v35 }
  0x66   :  { %370 = vmatpush.msra.mxu1 %v1107_v37 }
  0x68   :  { %371 = vmatpush.msra.mxu1 %v1112_v38 }
  0x6a   :  { %372 = vmatpush.msra.mxu1 %v1118_v40 }
  0x6c   :  { %373 = vmatpush.msra.mxu1 %v1123_v41 }
  0x90   :  { %v134_v55 = vpop.f32.mrf.mxu0 }
  0x91   :  { %v135_v56 = vadd.f32 %v1233_v54, %v134_v55 }
  0xa6   :  { %v137_v61 = vpop.f32.mrf.mxu0 }
  0xa7   :  { %v138_v62 = vadd.f32 %v1233_v54, %v137_v61  ;;  %v85_v61 = vld [vmem:[%s1597_s0 + $0x38] sm:$0xff] }
  0xaa   :  { %v224_v57 = vpop.f32.mrf.mxu1 }
  0xab   :  { %v227_v58 = vadd.f32 %v224_v57, %v135_v56  ;;  %v82_v57 = vld [vmem:[%s1597_s0 + $0x20] sm:$0xff] }
  0xac   :  { %799 = vmatmul.msk.f32.vlgmr.msra.gmra.mxu2 %vm92_vm0, %v82_v57 }
  0xad   :  { %814 = vtanh.f32 %v227_v58  ;;  %462 = vmatpush.msra.mxu2 %v987_v0  ;;  %v83_v58 = vld [vmem:[%s1597_s0 + $0x28] sm:$0xff] }
  0xaf   :  { %463 = vmatpush.msra.mxu2 %v989_v1 }
  0xb1   :  { %464 = vmatpush.msra.mxu2 %v992_v2 }
  0xb3   :  { %v815_v59 = vpop.eup %814  ;;  %465 = vmatpush.msra.mxu2 %v995_v3 }
  0xb4   :  { %248 = vmatmul.f32.vlgmr.msra.gmra.mxu3 %v815_v59  ;;  %289 = vmatmul.f32.vlgmr.msrb.gmra.mxu1 %v815_v59  ;;  %v84_v59 = vld [vmem:[%s1597_s0 + $0x30] sm:$0xff] }
  0xb5   :  { %315 = vmatpush.msra.mxu3 %v1028_v14  ;;  %441 = vmatpush.msrb.mxu1 %v1028_v14 }
  0xb6   :  { %466 = vmatpush.msra.mxu2 %v1007_v7 }
  0xb7   :  { %316 = vmatpush.msra.mxu3 %v1038_v17  ;;  %442 = vmatpush.msrb.mxu1 %v1038_v17 }
  0xb8   :  { %467 = vmatpush.msra.mxu2 %v1014_v10  ;;  %v140_v60 = vpop.f32.mrf.mxu0 }
  0xb9   :  { %317 = vmatpush.msra.mxu3 %v1048_v20  ;;  %443 = vmatpush.msrb.mxu1 %v1048_v20 }
  0xba   :  { %468 = vmatpush.msra.mxu2 %v1022_v12 }
  0xbb   :  { %318 = vmatpush.msra.mxu3 %v1058_v23  ;;  %444 = vmatpush.msrb.mxu1 %v1058_v23 }
  0xbc   :  { %268 = vmatmul.f32.vlgmr.msrb.gmra.mxu3 %v927_v39  ;;  %v1293_v39 = vld [vmem:[%s1602_s5] ss:$0 sm:$0xff]  ;;  %469 = vmatpush.msra.mxu2 %v1031_v15 }
  0xbd   :  { %319 = vmatpush.msra.mxu3 %v1068_v26  ;;  %445 = vmatpush.msrb.mxu1 %v1068_v26 }
  0xbe   :  { %470 = vmatpush.msra.mxu2 %v1041_v18 }
  0xbf   :  { %320 = vmatpush.msra.mxu3 %v1078_v29  ;;  %446 = vmatpush.msrb.mxu1 %v1078_v29 }
  0xc0   :  { %471 = vmatpush.msra.mxu2 %v1051_v21 }
  0xc1   :  { %321 = vmatpush.msra.mxu3 %v1182_v42  ;;  %447 = vmatpush.msrb.mxu1 %v1182_v42 }
  0xc2   :  { %472 = vmatpush.msra.mxu2 %v1061_v24 }
  0xc3   :  { %322 = vmatpush.msra.mxu3 %v1186_v43  ;;  %448 = vmatpush.msrb.mxu1 %v1186_v43 }
  0xc4   :  { %473 = vmatpush.msra.mxu2 %v1071_v27 }
  0xc5   :  { %323 = vmatpush.msra.mxu3 %v1190_v44  ;;  %449 = vmatpush.msrb.mxu1 %v1190_v44 }
  0xc6   :  { %474 = vmatpush.msra.mxu2 %v1081_v30 }
  0xc7   :  { %324 = vmatpush.msra.mxu3 %v1193_v45  ;;  %450 = vmatpush.msrb.mxu1 %v1193_v45 }
  0xc8   :  { %475 = vmatpush.msra.mxu2 %v1089_v32 }
  0xc9   :  { %325 = vmatpush.msra.mxu3 %v1199_v47  ;;  %451 = vmatpush.msrb.mxu1 %v1199_v47 }
  0xca   :  { %476 = vmatpush.msra.mxu2 %v1096_v34 }
  0xcb   :  { %326 = vmatpush.msra.mxu3 %v1204_v48  ;;  %452 = vmatpush.msrb.mxu1 %v1204_v48 }
  0xcc   :  { %477 = vmatpush.msra.mxu2 %v1103_v36 }
  0xcd   :  { %327 = vmatpush.msra.mxu3 %v1210_v49  ;;  %453 = vmatpush.msrb.mxu1 %v1210_v49 }
  0xce   :  { %800 = vmatmul.msk.f32.gmra.mxu2 %vm92_vm0, %v83_v58 }
  0xcf   :  { %328 = vmatpush.msra.mxu3 %v1212_v50  ;;  %454 = vmatpush.msrb.mxu1 %v1212_v50 }
  0xd1   :  { %329 = vmatpush.msra.mxu3 %v1216_v51  ;;  %455 = vmatpush.msrb.mxu1 %v1216_v51 }
  0xd3   :  { %330 = vmatpush.msra.mxu3 %v1220_v52  ;;  %456 = vmatpush.msrb.mxu1 %v1220_v52 }
  0xd5   :  { %399 = vmatpush.msrb.mxu3 %v987_v0 }
  0xd6   :  { %801 = vmatmul.msk.f32.gmra.mxu2 %vm92_vm0, %v84_v59 }
  0xd7   :  { %400 = vmatpush.msrb.mxu3 %v989_v1 }
  0xd9   :  { %401 = vmatpush.msrb.mxu3 %v992_v2 }
  0xdb   :  { %402 = vmatpush.msrb.mxu3 %v995_v3 }
  0xdd   :  { %403 = vmatpush.msrb.mxu3 %v1007_v7 }
  0xde   :  { %802 = vmatmul.msk.f32.gmra.mxu2 %vm92_vm0, %v85_v61 }
  0xdf   :  { %404 = vmatpush.msrb.mxu3 %v1014_v10 }
  0xe1   :  { %405 = vmatpush.msrb.mxu3 %v1022_v12 }
  0xe3   :  { %406 = vmatpush.msrb.mxu3 %v1031_v15 }
  0xe5   :  { %407 = vmatpush.msrb.mxu3 %v1041_v18 }
  0xe7   :  { %408 = vmatpush.msrb.mxu3 %v1051_v21 }
  0xe9   :  { %409 = vmatpush.msrb.mxu3 %v1061_v24 }
  0xeb   :  { %410 = vmatpush.msrb.mxu3 %v1071_v27 }
  0xed   :  { %411 = vmatpush.msrb.mxu3 %v1081_v30 }
  0xef   :  { %412 = vmatpush.msrb.mxu3 %v1089_v32 }
  0xf1   :  { %413 = vmatpush.msrb.mxu3 %v1096_v34 }
  0xf3   :  { %414 = vmatpush.msrb.mxu3 %v1103_v36 }
 0x12f   :  { %v1434_v59 = vpop.f32.mrf.mxu2 }
 0x131   :  { %v290_v63 = vpop.f32.mrf.mxu1 }
 0x132   :  { %v293_v4 = vadd.f32 %v290_v63, %v138_v62  ;;  %v1378_v62 = vpop.f32.mrf.mxu0 }
 0x134   :  { %816 = vtanh.f32 %v293_v4  ;;  %v141_v4 = vadd.f32 %v1233_v54, %v140_v60 }
 0x137   :  { %v249_v5 = vpop.f32.mrf.mxu3 }
 0x138   :  { %v250_v46 = vadd.f32 %v1293_v39, %v249_v5 }
 0x13a   :  { %v817_v6 = vpop.eup %816 }
 0x13b   :  { %311 = vmatmul.f32.vlgmr.msrb.gmra.mxu0 %v817_v6 }
 0x13c   :  { %421 = vmatpush.msrb.mxu0 %v1009_v8 }
 0x13e   :  { %422 = vmatpush.msrb.mxu0 %v1012_v9 }
 0x13f   :  { %v269_v53 = vpop.f32.mrf.mxu3 }
 0x140   :  { %v270_v55 = vadd.f32 %v269_v53, %v250_v46  ;;  %423 = vmatpush.msrb.mxu0 %v1019_v11 }
 0x142   :  { %818 = vtanh.f32 %v270_v55  ;;  %424 = vmatpush.msrb.mxu0 %v1026_v13 }
 0x143   :  { %352 = vmatmul.f32.vlgmr.msra.gmra.mxu0 %v817_v6 }
 0x144   :  { %425 = vmatpush.msrb.mxu0 %v1034_v16 }
 0x146   :  { %426 = vmatpush.msrb.mxu0 %v1046_v19 }
 0x148   :  { %v1302_v56 = vpop.eup %818  ;;  %427 = vmatpush.msrb.mxu0 %v1056_v22 }
 0x149   :  { %331 = vmatmul.f32.vlgmr.msra.gmra.mxu3 %v1302_v56 }
 0x14a   :  { %428 = vmatpush.msrb.mxu0 %v1066_v25  ;;  %484 = vmatpush.msra.mxu3 %v1009_v8 }
 0x14c   :  { %429 = vmatpush.msrb.mxu0 %v1076_v28  ;;  %485 = vmatpush.msra.mxu3 %v1012_v9 }
 0x14e   :  { %430 = vmatpush.msrb.mxu0 %v1086_v31  ;;  %486 = vmatpush.msra.mxu3 %v1019_v11 }
 0x150   :  { %431 = vmatpush.msrb.mxu0 %v1093_v33  ;;  %487 = vmatpush.msra.mxu3 %v1026_v13 }
 0x151   :  { %v1436_v60 = vpop.f32.mrf.mxu2 }
 0x152   :  { %432 = vmatpush.msrb.mxu0 %v1100_v35  ;;  %488 = vmatpush.msra.mxu3 %v1034_v16 }
 0x154   :  { %433 = vmatpush.msrb.mxu0 %v1107_v37  ;;  %489 = vmatpush.msra.mxu3 %v1046_v19 }
 0x156   :  { %434 = vmatpush.msrb.mxu0 %v1112_v38  ;;  %490 = vmatpush.msra.mxu3 %v1056_v22 }
 0x158   :  { %435 = vmatpush.msrb.mxu0 %v1118_v40  ;;  %491 = vmatpush.msra.mxu3 %v1066_v25 }
 0x159   :  { %v1438_v61 = vpop.f32.mrf.mxu2 }
 0x15a   :  { %436 = vmatpush.msrb.mxu0 %v1123_v41  ;;  %492 = vmatpush.msra.mxu3 %v1076_v28 }
 0x15c   :  { %504 = vmatpush.msra.mxu0 %v1028_v14  ;;  %493 = vmatpush.msra.mxu3 %v1086_v31 }
 0x15e   :  { %505 = vmatpush.msra.mxu0 %v1038_v17  ;;  %494 = vmatpush.msra.mxu3 %v1093_v33 }
 0x160   :  { %506 = vmatpush.msra.mxu0 %v1048_v20  ;;  %495 = vmatpush.msra.mxu3 %v1100_v35 }
 0x162   :  { %507 = vmatpush.msra.mxu0 %v1058_v23  ;;  %496 = vmatpush.msra.mxu3 %v1107_v37 }
 0x164   :  { %508 = vmatpush.msra.mxu0 %v1068_v26  ;;  %497 = vmatpush.msra.mxu3 %v1112_v38 }
 0x166   :  { %509 = vmatpush.msra.mxu0 %v1078_v29  ;;  %498 = vmatpush.msra.mxu3 %v1118_v40 }
 0x168   :  { %510 = vmatpush.msra.mxu0 %v1182_v42  ;;  %499 = vmatpush.msra.mxu3 %v1123_v41 }
 0x16a   :  { %511 = vmatpush.msra.mxu0 %v1186_v43 }
 0x16c   :  { %512 = vmatpush.msra.mxu0 %v1190_v44 }
 0x16e   :  { %513 = vmatpush.msra.mxu0 %v1193_v45 }
 0x170   :  { %514 = vmatpush.msra.mxu0 %v1199_v47 }
 0x172   :  { %515 = vmatpush.msra.mxu0 %v1204_v48 }
 0x174   :  { %516 = vmatpush.msra.mxu0 %v1210_v49 }
 0x176   :  { %517 = vmatpush.msra.mxu0 %v1212_v50 }
 0x178   :  { %518 = vmatpush.msra.mxu0 %v1216_v51 }
 0x17a   :  { %519 = vmatpush.msra.mxu0 %v1220_v52 }
 0x1b8   :  { %v312_v63 = vpop.f32.mrf.mxu0 }
 0x1b9   :  { %v313_v53 = vadd.f32 %v1293_v39, %v312_v63  ;;  %v144_v63 = vadd.f32 %v1233_v54, %v1378_v62 }
 0x1c0   :  { %v353_v5 = vpop.f32.mrf.mxu0 }
 0x1c1   :  { %v356_v6 = vadd.f32 %v353_v5, %v141_v4 }
 0x1c3   :  { %820 = vtanh.f32 %v356_v6  ;;  %v1442_v6 = vpop.f32.mrf.mxu2 }
 0x1c9   :  { %v821_v46 = vpop.eup %820 }
 0x1ca   :  { %374 = vmatmul.f32.vlgmr.msra.gmra.mxu1 %v821_v46  ;;  %415 = vmatmul.f32.vlgmr.msrb.gmra.mxu3 %v821_v46 }
 0x1cb   :  { %525 = vmatpush.msra.mxu1 %v987_v0  ;;  %567 = vmatpush.msrb.mxu3 %v1028_v14 }
 0x1cc   :  { %v332_v55 = vpop.f32.mrf.mxu3 }
 0x1cd   :  { %v333_v57 = vadd.f32 %v332_v55, %v313_v53  ;;  %526 = vmatpush.msra.mxu1 %v989_v1  ;;  %568 = vmatpush.msrb.mxu3 %v1038_v17 }
 0x1cf   :  { %822 = vtanh.f32 %v333_v57  ;;  %527 = vmatpush.msra.mxu1 %v992_v2  ;;  %569 = vmatpush.msrb.mxu3 %v1048_v20 }
 0x1d1   :  { %528 = vmatpush.msra.mxu1 %v995_v3  ;;  %570 = vmatpush.msrb.mxu3 %v1058_v23 }
 0x1d3   :  { %529 = vmatpush.msra.mxu1 %v1007_v7  ;;  %571 = vmatpush.msrb.mxu3 %v1068_v26 }
 0x1d5   :  { %v1393_v58 = vpop.eup %822  ;;  %530 = vmatpush.msra.mxu1 %v1014_v10  ;;  %572 = vmatpush.msrb.mxu3 %v1078_v29 }
 0x1d6   :  { %1608 = vst [vmem:[#allocation9_spill] sm:$0xff] %v1393_v58  ;;  %394 = vmatmul.f32.vlgmr.msrb.gmra.mxu2 %v1393_v58 }
 0x1d7   :  { %531 = vmatpush.msra.mxu1 %v1022_v12  ;;  %547 = vmatpush.msrb.mxu2 %v1009_v8 }
 0x1d8   :  { %573 = vmatpush.msrb.mxu3 %v1182_v42 }
 0x1d9   :  { %532 = vmatpush.msra.mxu1 %v1031_v15  ;;  %548 = vmatpush.msrb.mxu2 %v1012_v9 }
 0x1da   :  { %574 = vmatpush.msrb.mxu3 %v1186_v43 }
 0x1db   :  { %533 = vmatpush.msra.mxu1 %v1041_v18  ;;  %549 = vmatpush.msrb.mxu2 %v1019_v11 }
 0x1dc   :  { %575 = vmatpush.msrb.mxu3 %v1190_v44 }
 0x1dd   :  { %534 = vmatpush.msra.mxu1 %v1051_v21  ;;  %550 = vmatpush.msrb.mxu2 %v1026_v13 }
 0x1de   :  { %576 = vmatpush.msrb.mxu3 %v1193_v45 }
 0x1df   :  { %535 = vmatpush.msra.mxu1 %v1061_v24  ;;  %551 = vmatpush.msrb.mxu2 %v1034_v16 }
 0x1e0   :  { %577 = vmatpush.msrb.mxu3 %v1199_v47 }
 0x1e1   :  { %536 = vmatpush.msra.mxu1 %v1071_v27  ;;  %552 = vmatpush.msrb.mxu2 %v1046_v19 }
 0x1e2   :  { %578 = vmatpush.msrb.mxu3 %v1204_v48 }
 0x1e3   :  { %537 = vmatpush.msra.mxu1 %v1081_v30  ;;  %553 = vmatpush.msrb.mxu2 %v1056_v22 }
 0x1e4   :  { %579 = vmatpush.msrb.mxu3 %v1210_v49 }
 0x1e5   :  { %538 = vmatpush.msra.mxu1 %v1089_v32  ;;  %554 = vmatpush.msrb.mxu2 %v1066_v25 }
 0x1e6   :  { %580 = vmatpush.msrb.mxu3 %v1212_v50 }
 0x1e7   :  { %539 = vmatpush.msra.mxu1 %v1096_v34  ;;  %555 = vmatpush.msrb.mxu2 %v1076_v28 }
 0x1e8   :  { %581 = vmatpush.msrb.mxu3 %v1216_v51 }
 0x1e9   :  { %540 = vmatpush.msra.mxu1 %v1103_v36  ;;  %556 = vmatpush.msrb.mxu2 %v1086_v31 }
 0x1ea   :  { %582 = vmatpush.msrb.mxu3 %v1220_v52 }
 0x1eb   :  { %557 = vmatpush.msrb.mxu2 %v1093_v33 }
 0x1ed   :  { %558 = vmatpush.msrb.mxu2 %v1100_v35 }
 0x1ef   :  { %559 = vmatpush.msrb.mxu2 %v1107_v37 }
 0x1f1   :  { %560 = vmatpush.msrb.mxu2 %v1112_v38 }
 0x1f3   :  { %561 = vmatpush.msrb.mxu2 %v1118_v40 }
 0x1f5   :  { %562 = vmatpush.msrb.mxu2 %v1123_v41 }
 0x247   :  { %v375_v46 = vpop.f32.mrf.mxu1 }
 0x248   :  { %v376_v55 = vadd.f32 %v1293_v39, %v375_v46 }
 0x24d   :  { %v416_v4 = vpop.f32.mrf.mxu3 }
 0x24e   :  { %v419_v5 = vadd.f32 %v416_v4, %v144_v63 }
 0x250   :  { %824 = vtanh.f32 %v419_v5 }
 0x256   :  { %v825_v53 = vpop.eup %824 }
 0x257   :  { %437 = vmatmul.f32.vlgmr.msrb.gmra.mxu0 %v825_v53  ;;  %478 = vmatmul.f32.vlgmr.msra.gmra.mxu2 %v825_v53 }
 0x258   :  { %588 = vmatpush.msrb.mxu0 %v987_v0  ;;  %630 = vmatpush.msra.mxu2 %v1028_v14 }
 0x259   :  { %v395_v57 = vpop.f32.mrf.mxu2 }
 0x25a   :  { %v396_v58 = vadd.f32 %v395_v57, %v376_v55  ;;  %589 = vmatpush.msrb.mxu0 %v989_v1  ;;  %631 = vmatpush.msra.mxu2 %v1038_v17 }
 0x25c   :  { %826 = vtanh.f32 %v396_v58  ;;  %590 = vmatpush.msrb.mxu0 %v992_v2  ;;  %632 = vmatpush.msra.mxu2 %v1048_v20  ;;  %v147_v58 = vadd.f32 %v1233_v54, %v1434_v59 }
 0x25e   :  { %591 = vmatpush.msrb.mxu0 %v995_v3  ;;  %633 = vmatpush.msra.mxu2 %v1058_v23 }
 0x260   :  { %592 = vmatpush.msrb.mxu0 %v1007_v7  ;;  %634 = vmatpush.msra.mxu2 %v1068_v26 }
 0x262   :  { %v1455_v62 = vpop.eup %826  ;;  %593 = vmatpush.msrb.mxu0 %v1014_v10  ;;  %635 = vmatpush.msra.mxu2 %v1078_v29 }
 0x263   :  { %457 = vmatmul.f32.vlgmr.msrb.gmra.mxu1 %v1455_v62 }
 0x264   :  { %594 = vmatpush.msrb.mxu0 %v1022_v12  ;;  %610 = vmatpush.msrb.mxu1 %v1009_v8 }
 0x265   :  { %636 = vmatpush.msra.mxu2 %v1182_v42 }
 0x266   :  { %595 = vmatpush.msrb.mxu0 %v1031_v15  ;;  %611 = vmatpush.msrb.mxu1 %v1012_v9 }
 0x267   :  { %637 = vmatpush.msra.mxu2 %v1186_v43 }
 0x268   :  { %596 = vmatpush.msrb.mxu0 %v1041_v18  ;;  %612 = vmatpush.msrb.mxu1 %v1019_v11 }
 0x269   :  { %638 = vmatpush.msra.mxu2 %v1190_v44 }
 0x26a   :  { %597 = vmatpush.msrb.mxu0 %v1051_v21  ;;  %613 = vmatpush.msrb.mxu1 %v1026_v13 }
 0x26b   :  { %639 = vmatpush.msra.mxu2 %v1193_v45 }
 0x26c   :  { %598 = vmatpush.msrb.mxu0 %v1061_v24  ;;  %614 = vmatpush.msrb.mxu1 %v1034_v16 }
 0x26d   :  { %640 = vmatpush.msra.mxu2 %v1199_v47 }
 0x26e   :  { %599 = vmatpush.msrb.mxu0 %v1071_v27  ;;  %615 = vmatpush.msrb.mxu1 %v1046_v19 }
 0x26f   :  { %641 = vmatpush.msra.mxu2 %v1204_v48 }
 0x270   :  { %600 = vmatpush.msrb.mxu0 %v1081_v30  ;;  %616 = vmatpush.msrb.mxu1 %v1056_v22 }
 0x271   :  { %642 = vmatpush.msra.mxu2 %v1210_v49 }
 0x272   :  { %601 = vmatpush.msrb.mxu0 %v1089_v32  ;;  %617 = vmatpush.msrb.mxu1 %v1066_v25 }
 0x273   :  { %643 = vmatpush.msra.mxu2 %v1212_v50 }
 0x274   :  { %602 = vmatpush.msrb.mxu0 %v1096_v34  ;;  %618 = vmatpush.msrb.mxu1 %v1076_v28 }
 0x275   :  { %644 = vmatpush.msra.mxu2 %v1216_v51 }
 0x276   :  { %603 = vmatpush.msrb.mxu0 %v1103_v36  ;;  %619 = vmatpush.msrb.mxu1 %v1086_v31 }
 0x277   :  { %645 = vmatpush.msra.mxu2 %v1220_v52 }
 0x278   :  { %620 = vmatpush.msrb.mxu1 %v1093_v33 }
 0x27a   :  { %621 = vmatpush.msrb.mxu1 %v1100_v35 }
 0x27c   :  { %622 = vmatpush.msrb.mxu1 %v1107_v37 }
 0x27e   :  { %623 = vmatpush.msrb.mxu1 %v1112_v38 }
 0x280   :  { %624 = vmatpush.msrb.mxu1 %v1118_v40 }
 0x282   :  { %625 = vmatpush.msrb.mxu1 %v1123_v41 }
 0x2d4   :  { %v438_v5 = vpop.f32.mrf.mxu0 }
 0x2d5   :  { %v439_v46 = vadd.f32 %v1293_v39, %v438_v5 }
 0x2da   :  { %v479_v63 = vpop.f32.mrf.mxu2 }
 0x2db   :  { %v482_v4 = vadd.f32 %v479_v63, %v147_v58 }
 0x2dd   :  { %828 = vtanh.f32 %v482_v4 }
 0x2e0   :  { %v458_v53 = vpop.f32.mrf.mxu1 }
 0x2e1   :  { %v459_v55 = vadd.f32 %v458_v53, %v439_v46 }
 0x2e3   :  { %v829_v57 = vpop.eup %828  ;;  %830 = vtanh.f32 %v459_v55 }
 0x2e4   :  { %500 = vmatmul.f32.vlgmr.msra.gmra.mxu3 %v829_v57  ;;  %541 = vmatmul.f32.vlgmr.msra.gmra.mxu1 %v829_v57 }
 0x2e5   :  { %651 = vmatpush.msra.mxu3 %v987_v0  ;;  %693 = vmatpush.msra.mxu1 %v1028_v14  ;;  %v150_v0 = vadd.f32 %v1233_v54, %v1436_v60  ;;  %v727_v14 = vld [vmem:[#allocation6 + $0x68] sm:$0xff] }
 0x2e7   :  { %652 = vmatpush.msra.mxu3 %v989_v1  ;;  %694 = vmatpush.msra.mxu1 %v1038_v17  ;;  %v724_v17 = vld [vmem:[#allocation6 + $0x50] sm:$0xff] }
 0x2e9   :  { %v1503_v59 = vpop.eup %830  ;;  %653 = vmatpush.msra.mxu3 %v992_v2  ;;  %695 = vmatpush.msra.mxu1 %v1048_v20  ;;  %v721_v20 = vld [vmem:[#allocation6 + $0x38] sm:$0xff] }
 0x2ea   :  { %520 = vmatmul.f32.vlgmr.msra.gmra.mxu0 %v1503_v59 }
 0x2eb   :  { %654 = vmatpush.msra.mxu3 %v995_v3  ;;  %673 = vmatpush.msra.mxu0 %v1009_v8 }
 0x2ec   :  { %696 = vmatpush.msra.mxu1 %v1058_v23  ;;  %v718_v23 = vld [vmem:[#allocation6 + $0x20] sm:$0xff] }
 0x2ed   :  { %655 = vmatpush.msra.mxu3 %v1007_v7  ;;  %674 = vmatpush.msra.mxu0 %v1012_v9 }
 0x2ee   :  { %697 = vmatpush.msra.mxu1 %v1068_v26  ;;  %v715_v26 = vld [vmem:[#allocation6 + $0x8] sm:$0xff] }
 0x2ef   :  { %656 = vmatpush.msra.mxu3 %v1014_v10  ;;  %675 = vmatpush.msra.mxu0 %v1019_v11 }
 0x2f0   :  { %698 = vmatpush.msra.mxu1 %v1078_v29 }
 0x2f1   :  { %657 = vmatpush.msra.mxu3 %v1022_v12  ;;  %676 = vmatpush.msra.mxu0 %v1026_v13  ;;  %v729_v12 = vld [vmem:[#allocation6 + $0x78] sm:$0xff]  ;;  %v728_v13 = vld [vmem:[#allocation6 + $0x70] sm:$0xff] }
 0x2f2   :  { %699 = vmatpush.msra.mxu1 %v1182_v42 }
 0x2f3   :  { %658 = vmatpush.msra.mxu3 %v1031_v15  ;;  %677 = vmatpush.msra.mxu0 %v1034_v16  ;;  %v726_v15 = vld [vmem:[#allocation6 + $0x60] sm:$0xff]  ;;  %v725_v16 = vld [vmem:[#allocation6 + $0x58] sm:$0xff] }
 0x2f4   :  { %700 = vmatpush.msra.mxu1 %v1186_v43 }
 0x2f5   :  { %659 = vmatpush.msra.mxu3 %v1041_v18  ;;  %678 = vmatpush.msra.mxu0 %v1046_v19  ;;  %v723_v18 = vld [vmem:[#allocation6 + $0x48] sm:$0xff]  ;;  %v722_v19 = vld [vmem:[#allocation6 + $0x40] sm:$0xff] }
 0x2f6   :  { %701 = vmatpush.msra.mxu1 %v1190_v44 }
 0x2f7   :  { %660 = vmatpush.msra.mxu3 %v1051_v21  ;;  %679 = vmatpush.msra.mxu0 %v1056_v22  ;;  %v720_v21 = vld [vmem:[#allocation6 + $0x30] sm:$0xff]  ;;  %v719_v22 = vld [vmem:[#allocation6 + $0x28] sm:$0xff] }
 0x2f8   :  { %702 = vmatpush.msra.mxu1 %v1193_v45 }
 0x2f9   :  { %661 = vmatpush.msra.mxu3 %v1061_v24  ;;  %680 = vmatpush.msra.mxu0 %v1066_v25  ;;  %v717_v24 = vld [vmem:[#allocation6 + $0x18] sm:$0xff]  ;;  %v716_v25 = vld [vmem:[#allocation6 + $0x10] sm:$0xff] }
 0x2fa   :  { %703 = vmatpush.msra.mxu1 %v1199_v47 }
 0x2fb   :  { %662 = vmatpush.msra.mxu3 %v1071_v27  ;;  %681 = vmatpush.msra.mxu0 %v1076_v28  ;;  %v714_v27 = vld [vmem:[#allocation6] sm:$0xff]  ;;  %v153_v28 = vadd.f32 %v1233_v54, %v1438_v61 }
 0x2fc   :  { %704 = vmatpush.msra.mxu1 %v1204_v48  ;;  %v813_v48 = vld [vmem:[%s1604_s7] ss:$0 sm:$0xff] }
 0x2fd   :  { %663 = vmatpush.msra.mxu3 %v1081_v30  ;;  %682 = vmatpush.msra.mxu0 %v1086_v31 }
 0x2fe   :  { %705 = vmatpush.msra.mxu1 %v1210_v49 }
 0x2ff   :  { %664 = vmatpush.msra.mxu3 %v1089_v32  ;;  %683 = vmatpush.msra.mxu0 %v1093_v33 }
 0x300   :  { %706 = vmatpush.msra.mxu1 %v1212_v50 }
 0x301   :  { %665 = vmatpush.msra.mxu3 %v1096_v34  ;;  %684 = vmatpush.msra.mxu0 %v1100_v35 }
 0x302   :  { %707 = vmatpush.msra.mxu1 %v1216_v51 }
 0x303   :  { %666 = vmatpush.msra.mxu3 %v1103_v36  ;;  %685 = vmatpush.msra.mxu0 %v1107_v37  ;;  %v1609_v37 = vld [vmem:[#allocation9_spill] sm:$0xff] }
 0x304   :  { %708 = vmatpush.msra.mxu1 %v1220_v52 }
 0x305   :  { %686 = vmatpush.msra.mxu0 %v1112_v38  ;;  %v156_v38 = vadd.f32 %v1233_v54, %v1442_v6 }
 0x307   :  { %687 = vmatpush.msra.mxu0 %v1118_v40 }
 0x309   :  { %688 = vmatpush.msra.mxu0 %v1123_v41 }
 0x361   :  { %v542_v1 = vpop.f32.mrf.mxu1 }
 0x362   :  { %v545_v2 = vadd.f32 %v542_v1, %v150_v0 }
 0x364   :  { %832 = vtanh.f32 %v545_v2 }
 0x367   :  { %v501_v3 = vpop.f32.mrf.mxu3  ;;  %v521_v8 = vpop.f32.mrf.mxu0 }
 0x368   :  { %v502_v7 = vadd.f32 %v1293_v39, %v501_v3 }
 0x36a   :  { %v833_v9 = vpop.eup %832  ;;  %v522_v10 = vadd.f32 %v521_v8, %v502_v7 }
 0x36b   :  { %563 = vmatmul.f32.vlgmr.msrb.gmra.mxu2 %v833_v9  ;;  %604 = vmatmul.f32.vlgmr.msrb.gmra.mxu0 %v833_v9 }
 0x36c   :  { %834 = vtanh.f32 %v522_v10  ;;  %734 = vmatpush.msrb.mxu2 %v729_v12 }
 0x36e   :  { %735 = vmatpush.msrb.mxu2 %v728_v13 }
 0x370   :  { %736 = vmatpush.msrb.mxu2 %v727_v14 }
 0x372   :  { %v835_v11 = vpop.eup %834  ;;  %737 = vmatpush.msrb.mxu2 %v726_v15 }
 0x373   :  { %583 = vmatmul.f32.vlgmr.msrb.gmra.mxu3 %v835_v11 }
 0x374   :  { %738 = vmatpush.msrb.mxu2 %v725_v16 }
 0x376   :  { %739 = vmatpush.msrb.mxu2 %v724_v17 }
 0x378   :  { %740 = vmatpush.msrb.mxu2 %v723_v18 }
 0x37a   :  { %741 = vmatpush.msrb.mxu2 %v722_v19 }
 0x37c   :  { %742 = vmatpush.msrb.mxu2 %v721_v20 }
 0x37e   :  { %743 = vmatpush.msrb.mxu2 %v720_v21 }
 0x380   :  { %744 = vmatpush.msrb.mxu2 %v719_v22 }
 0x382   :  { %745 = vmatpush.msrb.mxu2 %v718_v23 }
 0x384   :  { %746 = vmatpush.msrb.mxu2 %v717_v24 }
 0x386   :  { %747 = vmatpush.msrb.mxu2 %v716_v25 }
 0x388   :  { %748 = vmatpush.msrb.mxu2 %v715_v26 }
 0x38a   :  { %749 = vmatpush.msrb.mxu2 %v714_v27 }
 0x3e8   :  { %v605_v29 = vpop.f32.mrf.mxu0 }
 0x3e9   :  { %v608_v30 = vadd.f32 %v605_v29, %v153_v28 }
 0x3eb   :  { %836 = vtanh.f32 %v608_v30 }
 0x3ee   :  { %v564_v32 = vpop.f32.mrf.mxu2 }
 0x3ef   :  { %v565_v33 = vadd.f32 %v1293_v39, %v564_v32 }
 0x3f1   :  { %v837_v31 = vpop.eup %836 }
 0x3f2   :  { %626 = vmatmul.f32.vlgmr.msrb.gmra.mxu1 %v837_v31  ;;  %667 = vmatmul.f32.vlgmr.msra.gmra.mxu3 %v837_v31 }
 0x3f6   :  { %v584_v34 = vpop.f32.mrf.mxu3 }
 0x3f7   :  { %v585_v35 = vadd.f32 %v584_v34, %v565_v33 }
 0x3f9   :  { %838 = vtanh.f32 %v585_v35 }
 0x3ff   :  { %v839_v36 = vpop.eup %838 }
 0x400   :  { %646 = vmatmul.f32.vlgmr.msra.gmra.mxu2 %v839_v36 }
 0x408   :  { %750 = vmatmul.f32.vlgmr.msrb.gmra.mxu2 %v1302_v56 }
 0x410   :  { %753 = vmatmul.f32.gmra.mxu2 %v1609_v37 }
 0x418   :  { %756 = vmatmul.f32.gmra.mxu2 %v1455_v62 }
 0x420   :  { %759 = vmatmul.f32.gmra.mxu2 %v1503_v59 }
 0x428   :  { %762 = vmatmul.f32.gmra.mxu2 %v835_v11 }
 0x430   :  { %765 = vmatmul.f32.gmra.mxu2 %v839_v36 }
 0x46f   :  { %v627_v43 = vpop.f32.mrf.mxu1 }
 0x470   :  { %v628_v44 = vadd.f32 %v1293_v39, %v627_v43 }
 0x475   :  { %v668_v40 = vpop.f32.mrf.mxu3 }
 0x476   :  { %v671_v41 = vadd.f32 %v668_v40, %v156_v38 }
 0x478   :  { %840 = vtanh.f32 %v671_v41 }
 0x47e   :  { %v841_v42 = vpop.eup %840 }
 0x47f   :  { %783 = vst [vmem:[%s1606_s9] sm:$0xff] %v841_v42  ;;  %689 = vmatmul.f32.vlgmr.msra.gmra.mxu0 %v841_v42 }
 0x483   :  { %v647_v45 = vpop.f32.mrf.mxu2 }
 0x484   :  { %v648_v47 = vadd.f32 %v647_v45, %v628_v44 }
 0x486   :  { %842 = vtanh.f32 %v648_v47 }
 0x48b   :  { %v751_v49 = vpop.f32.mrf.mxu2 }
 0x48c   :  { %v843_v50 = vpop.eup %842  ;;  %v752_v51 = vadd.f32 %v813_v48, %v751_v49 }
 0x48d   :  { %709 = vmatmul.f32.vlgmr.msra.gmra.mxu1 %v843_v50  ;;  %768 = vmatmul.f32.gmra.mxu2 %v843_v50 }
 0x48e   :  { %775 = vst [vmem:[%s1605_s8] sm:$0xff] %v752_v51 }
 0x493   :  { %v754_v52 = vpop.f32.mrf.mxu2 }
 0x494   :  { %v755_v54 = vadd.f32 %v813_v48, %v754_v52 }
 0x496   :  { %776 = vst [vmem:[%s1605_s8 + $0x8] sm:$0xff] %v755_v54 }
 0x49b   :  { %v757_v56 = vpop.f32.mrf.mxu2 }
 0x49c   :  { %v758_v60 = vadd.f32 %v813_v48, %v757_v56 }
 0x49e   :  { %777 = vst [vmem:[%s1605_s8 + $0x10] sm:$0xff] %v758_v60 }
 0x4a3   :  { %v760_v61 = vpop.f32.mrf.mxu2 }
 0x4a4   :  { %v761_v6 = vadd.f32 %v813_v48, %v760_v61 }
 0x4a6   :  { %778 = vst [vmem:[%s1605_s8 + $0x18] sm:$0xff] %v761_v6 }
 0x4ab   :  { %v763_v62 = vpop.f32.mrf.mxu2 }
 0x4ac   :  { %v764_v58 = vadd.f32 %v813_v48, %v763_v62 }
 0x4ae   :  { %779 = vst [vmem:[%s1605_s8 + $0x20] sm:$0xff] %v764_v58 }
 0x4b3   :  { %v766_v63 = vpop.f32.mrf.mxu2 }
 0x4b4   :  { %v767_v4 = vadd.f32 %v813_v48, %v766_v63 }
 0x4b6   :  { %780 = vst [vmem:[%s1605_s8 + $0x28] sm:$0xff] %v767_v4 }
 0x4fc   :  { %v690_v5 = vpop.f32.mrf.mxu0 }
 0x4fd   :  { %v691_v46 = vadd.f32 %v1293_v39, %v690_v5 }
 0x50a   :  { %v710_v53 = vpop.f32.mrf.mxu1 }
 0x50b   :  { %v711_v55 = vadd.f32 %v710_v53, %v691_v46 }
 0x50d   :  { %844 = vtanh.f32 %v711_v55 }
 0x510   :  { %v769_v57 = vpop.f32.mrf.mxu2 }
 0x511   :  { %v770_v59 = vadd.f32 %v813_v48, %v769_v57 }
 0x513   :  { %v845_v0 = vpop.eup %844  ;;  %781 = vst [vmem:[%s1605_s8 + $0x30] sm:$0xff] %v770_v59 }
 0x514   :  { %784 = vst [vmem:[%s1606_s9 + $0x8] sm:$0xff] %v845_v0  ;;  %771 = vmatmul.f32.gmra.mxu2 %v845_v0 }
 0x597   :  { %v772_v1 = vpop.f32.mrf.mxu2 }
 0x598   :  { %v773_v2 = vadd.f32 %v813_v48, %v772_v1 }
 0x59a   :  { %782 = vst [vmem:[%s1605_s8 + $0x38] sm:$0xff] %v773_v2 }
 0x59b   :  { %793 = vsyncpa [#allocation3], 1 }
 0x59c   :  { %794 = vsyncpa [#allocation5], 1 }

</bundles_post_ra>
